<compile_context>
chip_gen: v6e
topology: v6e:2x2x1
jax: 0.10.0
libtpu: 0.0.40
codegen_flags: <defaults>
</compile_context>

<pallas_src>
import jax
import jax.numpy as jnp
from jax.experimental import pallas as pl
from jax.experimental.pallas import tpu as pltpu


def _round_up(x, m):
    return (x + m - 1) // m * m


def fixed_flat_dqn_kernel(state_ref, t_ref, b1_ref, w2_ref, b2_ref,
                          w3_ref, b3_ref, o_ref):
    state = state_ref[...]                       # (TB, S) int32
    TB, S = state.shape
    SVp, H = t_ref.shape                         # fused table (S*Vp, H) bf16
    Vp = SVp // S

    # Lane-dense multi-hot over the fused (seq, vocab) axis:
    #   mh[b, s*Vp + v] = (state[b, s] == v).
    # Each state value is in [0, Vp), so for state column s only the s-th
    # Vp-wide band can match (col - s*Vp is outside [0, Vp) elsewhere).
    col = jax.lax.broadcasted_iota(jnp.int32, (TB, SVp), 1)
    mh = None
    for s in range(S):                           # S compares + ORs on (TB, S*Vp)
        eq = state[:, s:s + 1] == (col - s * Vp)
        mh = eq if mh is None else jnp.logical_or(mh, eq)
    mh = mh.astype(t_ref.dtype)                  # single bool->bf16 cast

    # Layer 1: embedding gather + first Linear fused into one K=S*Vp matmul.
    h1 = jnp.dot(mh, t_ref[...], preferred_element_type=jnp.float32)
    h1 = jnp.maximum(h1 + b1_ref[...], 0.0)

    h2 = jnp.dot(h1.astype(w2_ref.dtype), w2_ref[...],
                 preferred_element_type=jnp.float32) + b2_ref[...]
    h2 = jnp.maximum(h2, 0.0)

    out = jnp.dot(h2.astype(w3_ref.dtype), w3_ref[...],
                  preferred_element_type=jnp.float32) + b3_ref[...]
    o_ref[...] = out.astype(o_ref.dtype)


def _choose_blocking(B):
    """Pick (block_b, padded_B). Target ~512 rows/step; even grid for v7x."""
    Bp = _round_up(max(B, 8), 8)
    target = 512
    if Bp <= target:
        return Bp, Bp                            # single grid step
    n_steps = -(-Bp // target)                   # cdiv
    if n_steps % 2:                              # even grid -> both v7x TCs busy
        n_steps += 1
    block_b = _round_up(-(-Bp // n_steps), 8)
    return block_b, block_b * n_steps


@jax.jit
def fixed_flat_dqn_forward(state, emb, w1, b1, w2, b2, w3, b3):
    """Returns (B, out_pad) bf16; only columns [:action_n+1] are meaningful."""
    B, S = state.shape
    Vp, E = emb.shape
    H = w1.shape[1]
    out_pad = w3.shape[1]                        # padded to 128 lanes

    # Fused gather+Linear1 table: T[s*Vp + v] = emb[v] @ W1[s*E:(s+1)*E].
    fused_t = jnp.einsum(
        "ve,seh->svh",
        emb.astype(jnp.float32),
        w1.astype(jnp.float32).reshape(S, E, H),
        precision=jax.lax.Precision.HIGHEST,
    ).reshape(S * Vp, H).astype(jnp.bfloat16)

    block_b, Bp = _choose_blocking(B)
    if Bp != B:
        # Padded rows index the (zero) padding table rows; sliced off below.
        state = jnp.pad(state, ((0, Bp - B), (0, 0)))

    out = pl.pallas_call(
        fixed_flat_dqn_kernel,
        out_shape=jax.ShapeDtypeStruct((Bp, out_pad), jnp.bfloat16),
        grid_spec=pl.GridSpec(
            grid=(Bp // block_b,),
            in_specs=[
                pl.BlockSpec((block_b, S), lambda i: (i, 0)),     # state block
                pl.BlockSpec((S * Vp, H), lambda i: (0, 0)),      # fused table
                pl.BlockSpec((1, H), lambda i: (0, 0)),           # b1
                pl.BlockSpec((H, H), lambda i: (0, 0)),           # W2
                pl.BlockSpec((1, H), lambda i: (0, 0)),           # b2
                pl.BlockSpec((H, out_pad), lambda i: (0, 0)),     # W3 (padded)
                pl.BlockSpec((1, out_pad), lambda i: (0, 0)),     # b3 (padded)
            ],
            out_specs=pl.BlockSpec((block_b, out_pad), lambda i: (i, 0)),
        ),
        compiler_params=pltpu.CompilerParams(
            dimension_semantics=("parallel",),
            vmem_limit_bytes=48 * 1024 * 1024),
    )(state, fused_t, b1, w2, b2, w3, b3)

    if Bp != B:                                  # only copy when padding existed
        out = out[:B]
    return out


def init_params(key, action_n, seq_size, embedding_dim=32, hidden_dim=128,
                padding_idx=0):
    """Deterministic synthetic parameters with the module's shapes.

    Embedding rows padded to a multiple of 8 (extra rows zero, never selected);
    W3/b3 columns padded to 128 for lane-dense output stores.
    Weights/table cast to bf16 (kernel accumulates in f32), biases stay f32.
    """
    V = action_n + 1
    Vp = _round_up(V, 8)
    out_pad = _round_up(V, 128)

    ks = jax.random.split(key, 4)
    emb = jax.random.normal(ks[0], (V, embedding_dim), jnp.float32) * 0.1
    emb = emb.at[padding_idx].set(0.0)           # nn.Embedding padding_idx row
    emb = jnp.pad(emb, ((0, Vp - V), (0, 0)))

    def lin(k, fan_in, fan_out, pad_out=None):
        kw, kb = jax.random.split(k)
        bound = 1.0 / jnp.sqrt(fan_in)
        w = jax.random.uniform(kw, (fan_in, fan_out), jnp.float32, -bound, bound)
        b = jax.random.uniform(kb, (1, fan_out), jnp.float32, -bound, bound)
        if pad_out is not None and pad_out > fan_out:
            w = jnp.pad(w, ((0, 0), (0, pad_out - fan_out)))
            b = jnp.pad(b, ((0, 0), (0, pad_out - fan_out)))
        return w, b

    w1, b1 = lin(ks[1], seq_size * embedding_dim, hidden_dim)
    w2, b2 = lin(ks[2], hidden_dim, hidden_dim)
    w3, b3 = lin(ks[3], hidden_dim, V, pad_out=out_pad)

    emb = emb.astype(jnp.bfloat16)
    w1 = w1.astype(jnp.bfloat16)
    w2 = w2.astype(jnp.bfloat16)
    w3 = w3.astype(jnp.bfloat16)
    return emb, w1, b1, w2, b2, w3, b3


def reference_forward(state, emb, w1, b1, w2, b2, w3, b3, action_n):
    f32 = jnp.float32
    hp = jax.lax.Precision.HIGHEST
    x = jnp.take(emb.astype(f32), state, axis=0)             # (B, S, E)
    x = x.reshape(state.shape[0], -1)                        # (B, S*E)
    h = jnp.maximum(jnp.dot(x, w1.astype(f32), precision=hp) + b1, 0.0)
    h = jnp.maximum(jnp.dot(h, w2.astype(f32), precision=hp) + b2, 0.0)
    out = jnp.dot(h, w3.astype(f32), precision=hp) + b3
    return out[:, :action_n + 1]


if __name__ == "__main__":
    action_n = 5            # output dim = action_n + 1 = 6 (padded to 128 in-kernel)
    seq_size = 8
    embedding_dim = 32
    hidden_dim = 128
    padding_idx = 0
    B = 8

    key = jax.random.PRNGKey(0)
    kp, ks = jax.random.split(key)
    params = init_params(kp, action_n, seq_size, embedding_dim, hidden_dim,
                         padding_idx)
    state = jax.random.randint(ks, (B, seq_size), 0, action_n + 1,
                               dtype=jnp.int32)

    out_padded = fixed_flat_dqn_forward(state, *params)
    out_padded = jax.block_until_ready(out_padded)
    # Consumers slice off the zero-padded columns (only action_n+1 are real).
    out = out_padded[:, :action_n + 1].astype(jnp.float32)

    ref = reference_forward(state, *params, action_n=action_n)
    assert out.shape == (B, action_n + 1)
    assert jnp.allclose(out, ref, atol=2e-2, rtol=2e-2), float(
        jnp.max(jnp.abs(out - ref)))
    print("KERNEL_OK")
</pallas_src>

<mosaic_0001>
module attributes {stable_mosaic.version = 11 : i64} {
  func.func @fixed_flat_dqn_kernel(%arg0: i32, %arg1: memref<8x8xi32, #tpu.memory_space<vmem>>, %arg2: memref<64x128xbf16, #tpu.memory_space<vmem>>, %arg3: memref<1x128xf32, #tpu.memory_space<vmem>>, %arg4: memref<128x128xbf16, #tpu.memory_space<vmem>>, %arg5: memref<1x128xf32, #tpu.memory_space<vmem>>, %arg6: memref<128x128xbf16, #tpu.memory_space<vmem>>, %arg7: memref<1x128xf32, #tpu.memory_space<vmem>>, %arg8: memref<8x128xbf16, #tpu.memory_space<vmem>>) attributes {dimension_semantics = [#tpu.dimension_semantics<parallel>], iteration_bounds = array<i64: 1>, scalar_prefetch = 0 : i64, scratch_operands = 0 : i64, tpu.core_type = #tpu.core_type<tc>, window_params = [{transform_indices = @transform_0, window_bounds = array<i64: 8, 8>}, {pipeline_mode = #tpu.pipeline_mode<synchronous>, transform_indices = @transform_1, window_bounds = array<i64: 64, 128>}, {pipeline_mode = #tpu.pipeline_mode<synchronous>, transform_indices = @transform_2, window_bounds = array<i64: 1, 128>}, {pipeline_mode = #tpu.pipeline_mode<synchronous>, transform_indices = @transform_3, window_bounds = array<i64: 128, 128>}, {pipeline_mode = #tpu.pipeline_mode<synchronous>, transform_indices = @transform_4, window_bounds = array<i64: 1, 128>}, {pipeline_mode = #tpu.pipeline_mode<synchronous>, transform_indices = @transform_5, window_bounds = array<i64: 128, 128>}, {pipeline_mode = #tpu.pipeline_mode<synchronous>, transform_indices = @transform_6, window_bounds = array<i64: 1, 128>}, {transform_indices = @transform_7, window_bounds = array<i64: 8, 128>}]} {
    %c0 = arith.constant 0 : index
    %c0_0 = arith.constant 0 : index
    %0 = vector.load %arg1[%c0, %c0_0] : memref<8x8xi32, #tpu.memory_space<vmem>>, vector<8x8xi32>
    %1 = tpu.iota {dimensions = array<i32: 1>} : vector<8x64xi32>
    %2 = vector.extract_strided_slice %0 {offsets = [0, 0], sizes = [8, 1], strides = [1, 1]} : vector<8x8xi32> to vector<8x1xi32>
    %c0_i32 = arith.constant 0 : i32
    %3 = vector.broadcast %c0_i32 : i32 to vector<8x64xi32>
    %4 = arith.subi %1, %3 : vector<8x64xi32>
    %5 = vector.broadcast %2 : vector<8x1xi32> to vector<8x64xi32>
    %6 = arith.cmpi eq, %5, %4 : vector<8x64xi32>
    %7 = vector.extract_strided_slice %0 {offsets = [0, 1], sizes = [8, 1], strides = [1, 1]} : vector<8x8xi32> to vector<8x1xi32>
    %c8_i32 = arith.constant 8 : i32
    %8 = vector.broadcast %c8_i32 : i32 to vector<8x64xi32>
    %9 = arith.subi %1, %8 : vector<8x64xi32>
    %10 = vector.broadcast %7 : vector<8x1xi32> to vector<8x64xi32>
    %11 = arith.cmpi eq, %10, %9 : vector<8x64xi32>
    %12 = arith.ori %6, %11 : vector<8x64xi1>
    %13 = vector.extract_strided_slice %0 {offsets = [0, 2], sizes = [8, 1], strides = [1, 1]} : vector<8x8xi32> to vector<8x1xi32>
    %c16_i32 = arith.constant 16 : i32
    %14 = vector.broadcast %c16_i32 : i32 to vector<8x64xi32>
    %15 = arith.subi %1, %14 : vector<8x64xi32>
    %16 = vector.broadcast %13 : vector<8x1xi32> to vector<8x64xi32>
    %17 = arith.cmpi eq, %16, %15 : vector<8x64xi32>
    %18 = arith.ori %12, %17 : vector<8x64xi1>
    %19 = vector.extract_strided_slice %0 {offsets = [0, 3], sizes = [8, 1], strides = [1, 1]} : vector<8x8xi32> to vector<8x1xi32>
    %c24_i32 = arith.constant 24 : i32
    %20 = vector.broadcast %c24_i32 : i32 to vector<8x64xi32>
    %21 = arith.subi %1, %20 : vector<8x64xi32>
    %22 = vector.broadcast %19 : vector<8x1xi32> to vector<8x64xi32>
    %23 = arith.cmpi eq, %22, %21 : vector<8x64xi32>
    %24 = arith.ori %18, %23 : vector<8x64xi1>
    %25 = vector.extract_strided_slice %0 {offsets = [0, 4], sizes = [8, 1], strides = [1, 1]} : vector<8x8xi32> to vector<8x1xi32>
    %c32_i32 = arith.constant 32 : i32
    %26 = vector.broadcast %c32_i32 : i32 to vector<8x64xi32>
    %27 = arith.subi %1, %26 : vector<8x64xi32>
    %28 = vector.broadcast %25 : vector<8x1xi32> to vector<8x64xi32>
    %29 = arith.cmpi eq, %28, %27 : vector<8x64xi32>
    %30 = arith.ori %24, %29 : vector<8x64xi1>
    %31 = vector.extract_strided_slice %0 {offsets = [0, 5], sizes = [8, 1], strides = [1, 1]} : vector<8x8xi32> to vector<8x1xi32>
    %c40_i32 = arith.constant 40 : i32
    %32 = vector.broadcast %c40_i32 : i32 to vector<8x64xi32>
    %33 = arith.subi %1, %32 : vector<8x64xi32>
    %34 = vector.broadcast %31 : vector<8x1xi32> to vector<8x64xi32>
    %35 = arith.cmpi eq, %34, %33 : vector<8x64xi32>
    %36 = arith.ori %30, %35 : vector<8x64xi1>
    %37 = vector.extract_strided_slice %0 {offsets = [0, 6], sizes = [8, 1], strides = [1, 1]} : vector<8x8xi32> to vector<8x1xi32>
    %c48_i32 = arith.constant 48 : i32
    %38 = vector.broadcast %c48_i32 : i32 to vector<8x64xi32>
    %39 = arith.subi %1, %38 : vector<8x64xi32>
    %40 = vector.broadcast %37 : vector<8x1xi32> to vector<8x64xi32>
    %41 = arith.cmpi eq, %40, %39 : vector<8x64xi32>
    %42 = arith.ori %36, %41 : vector<8x64xi1>
    %43 = vector.extract_strided_slice %0 {offsets = [0, 7], sizes = [8, 1], strides = [1, 1]} : vector<8x8xi32> to vector<8x1xi32>
    %c56_i32 = arith.constant 56 : i32
    %44 = vector.broadcast %c56_i32 : i32 to vector<8x64xi32>
    %45 = arith.subi %1, %44 : vector<8x64xi32>
    %46 = vector.broadcast %43 : vector<8x1xi32> to vector<8x64xi32>
    %47 = arith.cmpi eq, %46, %45 : vector<8x64xi32>
    %48 = arith.ori %42, %47 : vector<8x64xi1>
    %49 = arith.extui %48 : vector<8x64xi1> to vector<8x64xi32>
    %50 = arith.sitofp %49 : vector<8x64xi32> to vector<8x64xf32>
    %51 = arith.truncf %50 : vector<8x64xf32> to vector<8x64xbf16>
    %c0_1 = arith.constant 0 : index
    %c0_2 = arith.constant 0 : index
    %52 = vector.load %arg2[%c0_1, %c0_2] : memref<64x128xbf16, #tpu.memory_space<vmem>>, vector<64x128xbf16>
    %cst = arith.constant dense<0.000000e+00> : vector<8x128xf32>
    %53 = tpu.matmul %51, %52, %cst {dimension_numbers = #tpu.dot_dimension_numbers<[1], [0], [0], [1], [0, 0, 1, 1], [], []>} : vector<8x64xbf16>, vector<64x128xbf16>, vector<8x128xf32> -> vector<8x128xf32>
    %c0_3 = arith.constant 0 : index
    %c0_4 = arith.constant 0 : index
    %54 = vector.load %arg3[%c0_3, %c0_4] : memref<1x128xf32, #tpu.memory_space<vmem>>, vector<1x128xf32>
    %55 = vector.broadcast %54 : vector<1x128xf32> to vector<8x128xf32>
    %56 = arith.addf %53, %55 : vector<8x128xf32>
    %cst_5 = arith.constant 0.000000e+00 : f32
    %57 = vector.broadcast %cst_5 : f32 to vector<8x128xf32>
    %58 = arith.maximumf %56, %57 : vector<8x128xf32>
    %59 = arith.truncf %58 : vector<8x128xf32> to vector<8x128xbf16>
    %c0_6 = arith.constant 0 : index
    %c0_7 = arith.constant 0 : index
    %60 = vector.load %arg4[%c0_6, %c0_7] : memref<128x128xbf16, #tpu.memory_space<vmem>>, vector<128x128xbf16>
    %cst_8 = arith.constant dense<0.000000e+00> : vector<8x128xf32>
    %61 = tpu.matmul %59, %60, %cst_8 {dimension_numbers = #tpu.dot_dimension_numbers<[1], [0], [0], [1], [0, 0, 1, 1], [], []>} : vector<8x128xbf16>, vector<128x128xbf16>, vector<8x128xf32> -> vector<8x128xf32>
    %c0_9 = arith.constant 0 : index
    %c0_10 = arith.constant 0 : index
    %62 = vector.load %arg5[%c0_9, %c0_10] : memref<1x128xf32, #tpu.memory_space<vmem>>, vector<1x128xf32>
    %63 = vector.broadcast %62 : vector<1x128xf32> to vector<8x128xf32>
    %64 = arith.addf %61, %63 : vector<8x128xf32>
    %cst_11 = arith.constant 0.000000e+00 : f32
    %65 = vector.broadcast %cst_11 : f32 to vector<8x128xf32>
    %66 = arith.maximumf %64, %65 : vector<8x128xf32>
    %67 = arith.truncf %66 : vector<8x128xf32> to vector<8x128xbf16>
    %c0_12 = arith.constant 0 : index
    %c0_13 = arith.constant 0 : index
    %68 = vector.load %arg6[%c0_12, %c0_13] : memref<128x128xbf16, #tpu.memory_space<vmem>>, vector<128x128xbf16>
    %cst_14 = arith.constant dense<0.000000e+00> : vector<8x128xf32>
    %69 = tpu.matmul %67, %68, %cst_14 {dimension_numbers = #tpu.dot_dimension_numbers<[1], [0], [0], [1], [0, 0, 1, 1], [], []>} : vector<8x128xbf16>, vector<128x128xbf16>, vector<8x128xf32> -> vector<8x128xf32>
    %c0_15 = arith.constant 0 : index
    %c0_16 = arith.constant 0 : index
    %70 = vector.load %arg7[%c0_15, %c0_16] : memref<1x128xf32, #tpu.memory_space<vmem>>, vector<1x128xf32>
    %71 = vector.broadcast %70 : vector<1x128xf32> to vector<8x128xf32>
    %72 = arith.addf %69, %71 : vector<8x128xf32>
    %73 = arith.truncf %72 : vector<8x128xf32> to vector<8x128xbf16>
    %c0_17 = arith.constant 0 : index
    %c0_18 = arith.constant 0 : index
    %74 = vector.load %arg8[%c0_17, %c0_18] : memref<8x128xbf16, #tpu.memory_space<vmem>>, vector<8x128xbf16>
    tpu.vector_store %arg8[%c0_17, %c0_18], %73 {strides = array<i32>} : memref<8x128xbf16, #tpu.memory_space<vmem>>, vector<8x128xbf16>,
    return
  }
  func.func @transform_0(%arg0: i32) -> (i32, i32) {
    %c0_i32 = arith.constant 0 : i32
    %c0_i32_0 = arith.constant 0 : i32
    return %arg0, %c0_i32 : i32, i32
  }
  func.func @transform_1(%arg0: i32) -> (i32, i32) {
    %c0_i32 = arith.constant 0 : i32
    %c0_i32_0 = arith.constant 0 : i32
    %c0_i32_1 = arith.constant 0 : i32
    return %c0_i32, %c0_i32_0 : i32, i32
  }
  func.func @transform_2(%arg0: i32) -> (i32, i32) {
    %c0_i32 = arith.constant 0 : i32
    %c0_i32_0 = arith.constant 0 : i32
    %c0_i32_1 = arith.constant 0 : i32
    return %c0_i32, %c0_i32_0 : i32, i32
  }
  func.func @transform_3(%arg0: i32) -> (i32, i32) {
    %c0_i32 = arith.constant 0 : i32
    %c0_i32_0 = arith.constant 0 : i32
    %c0_i32_1 = arith.constant 0 : i32
    return %c0_i32, %c0_i32_0 : i32, i32
  }
  func.func @transform_4(%arg0: i32) -> (i32, i32) {
    %c0_i32 = arith.constant 0 : i32
    %c0_i32_0 = arith.constant 0 : i32
    %c0_i32_1 = arith.constant 0 : i32
    return %c0_i32, %c0_i32_0 : i32, i32
  }
  func.func @transform_5(%arg0: i32) -> (i32, i32) {
    %c0_i32 = arith.constant 0 : i32
    %c0_i32_0 = arith.constant 0 : i32
    %c0_i32_1 = arith.constant 0 : i32
    return %c0_i32, %c0_i32_0 : i32, i32
  }
  func.func @transform_6(%arg0: i32) -> (i32, i32) {
    %c0_i32 = arith.constant 0 : i32
    %c0_i32_0 = arith.constant 0 : i32
    %c0_i32_1 = arith.constant 0 : i32
    return %c0_i32, %c0_i32_0 : i32, i32
  }
  func.func @transform_7(%arg0: i32) -> (i32, i32) {
    %c0_i32 = arith.constant 0 : i32
    %c0_i32_0 = arith.constant 0 : i32
    return %arg0, %c0_i32 : i32, i32
  }
}

</mosaic_0001>

<bundles_post_ra>
// kernel: fixed_flat_dqn_forward.1
= control target key start
LH: loop header
LB: loop body
LE: loop exit
PB: predicated region body
PF: predicated region fallthrough
CT: control target
= control target key end

     0   :  { %v574_v1 = vmov 2   ;;  %v575_v2 = vmov 0   ;;  %v576_v3 = vmov 3   ;;  %v577_v4 = vmov 1   ;;  %s727_s0 = inlined_call_operand.vmem [shape: s32[8,8], index: 0, kind: input, shape index: {}]   ;;  %s728_s1 = inlined_call_operand.vmem [shape: bf16[64,128], index: 1, kind: input, shape index: {}]   ;;  %s729_s2 = inlined_call_operand.vmem [shape: f32[1,128], index: 2, kind: input, shape index: {}]   ;;  %s730_s3 = inlined_call_operand.vmem [shape: bf16[128,128], index: 3, kind: input, shape index: {}]   ;;  %s731_s4 = inlined_call_operand.vmem [shape: f32[1,128], index: 4, kind: input, shape index: {}]   ;;  %s732_s5 = inlined_call_operand.vmem [shape: bf16[128,128], index: 5, kind: input, shape index: {}]   ;;  %s733_s6 = inlined_call_operand.vmem [shape: f32[1,128], index: 6, kind: input, shape index: {}]   ;;  %s734_s7 = inlined_call_operand.hbm [shape: bf16[8,128], index: 7, kind: output, shape index: {}]  }
   0x1   :  { %v28_v0 = vld [vmem:[%s727_s0] sm:$0xff]  ;;  %525 = vset.pattern.permute.xlu1 %v574_v1  ;;  %523 = vset.pattern.permute.xlu0 %v575_v2  ;;  %v532_v5 = vld [vmem:[%s728_s1 + $0x18] sm:$0xff]   ;;  %v578_v6 = vmov 0.0   ;;  %v533_v7 = vld [vmem:[%s728_s1 + $0x10] sm:$0xff]   ;;  %v579_v8 = vmov 4   ;;  %v580_v9 = vmov 5  }
   0x2   :  { %43 = vperm.xlu1 %525, %v28_v0   ;;  %32 = vperm.xlu0 %523, %v28_v0   ;;  %v534_v10 = vld [vmem:[%s728_s1 + $0x8] sm:$0xff]   ;;  %v581_v11 = vmov 6   ;;  %v582_v12 = vmov 7  }
   0x3   :  { %460 = vmatprep.subr.bf16.mxu0 %v578_v6  ;;  %472 = vmatprep.subr.bf16.mxu1 %v578_v6 }
   0x4   :  { %461 = vmatpush3.bf16.msra.mxu0 %v532_v5 }
   0x5   :  { %462 = vmatprep.subr.bf16.mxu0 %v578_v6 }
   0x6   :  { %526 = vset.pattern.permute.xlu1 %v576_v3  ;;  %524 = vset.pattern.permute.xlu0 %v577_v4 }
   0x7   :  { %49 = vperm.xlu1 %526, %v28_v0   ;;  %37 = vperm.xlu0 %524, %v28_v0  }
   0x8   :  { %463 = vmatpush3.bf16.msra.mxu0 %v533_v7 }
   0x9   :  { %464 = vmatprep.subr.bf16.mxu0 %v578_v6 }
   0xb   :  { %527 = vset.pattern.permute.xlu1 %v579_v8  ;;  %528 = vset.pattern.permute.xlu0 %v580_v9 }
   0xc   :  { %55 = vperm.xlu1 %527, %v28_v0   ;;  %61 = vperm.xlu0 %528, %v28_v0  }
   0xd   :  { %465 = vmatpush3.bf16.msra.mxu0 %v534_v10 }
  0x10   :  { %529 = vset.pattern.permute.xlu1 %v581_v11  ;;  %531 = vset.pattern.permute.xlu0 %v582_v12 }
  0x11   :  { %67 = vperm.xlu1 %529, %v28_v0  }
  0x12   :  { %12 = vsyncpa [#allocation3], 0  ;;  %466 = vmatprep.subr.bf16.mxu0 %v578_v6  ;;  %v535_v13 = vld [vmem:[%s728_s1] sm:$0xff]   ;;  %vm583_vm0 = vmmov 0   ;;  %v536_v14 = vld [vmem:[%s730_s3 + $0x38] sm:$0xff]   ;;  %v29_v20 = vlaneseq  ;;  %s584_s20 = smov [#allocation2]  }
  0x13   :  { %467 = vmatpush3.bf16.msra.mxu0 %v535_v13  ;;  %468 = vmatprep.mubr.msk.bf16.mxu0 %vm583_vm0, %v578_v6  ;;  %v537_v15 = vld [vmem:[%s730_s3 + $0x30] sm:$0xff]   ;;  %v538_v16 = vld [vmem:[%s730_s3 + $0x28] sm:$0xff]   ;;  %v539_v17 = vld [vmem:[%s730_s3 + $0x20] sm:$0xff]  }
  0x14   :  { %488 = vmatprep.mubr.msk.bf16.mxu1 %vm583_vm0, %v578_v6  ;;  %492 = vmatprep.subr.bf16.mxu0 %v578_v6  ;;  %v540_v18 = vld [vmem:[%s730_s3 + $0x18] sm:$0xff]   ;;  %v541_v19 = vld [vmem:[%s730_s3 + $0x10] sm:$0xff]   ;;  %v30_v23 = vand.u32 127, %v29_v20  ;;  %v542_v39 = vld [vmem:[%s730_s3 + $0x8] sm:$0xff]  }
  0x15   :  { %530 = vset.pattern.permute.xlu1 %v582_v12  ;;  %473 = vmatpush3.bf16.msra.mxu1 %v536_v14  ;;  %v543_v40 = vld [vmem:[%s730_s3] sm:$0xff]   ;;  %v544_v41 = vld [vmem:[%s732_s5 + $0x38] sm:$0xff]   ;;  %v545_v42 = vld [vmem:[%s732_s5 + $0x30] sm:$0xff]  }
  0x16   :  { %73 = vperm.xlu1 %530, %v28_v0   ;;  %474 = vmatprep.subr.bf16.mxu1 %v578_v6  ;;  %v405_v24 = vadd.s32 4294967288, %v30_v23  ;;  %v406_v27 = vadd.s32 4294967280, %v30_v23  ;;  %v408_v28 = vadd.s32 4294967264, %v30_v23  ;;  %v407_v30 = vadd.s32 4294967272, %v30_v23  ;;  %v546_v43 = vld [vmem:[%s732_s5 + $0x28] sm:$0xff]   ;;  %v547_v44 = vld [vmem:[%s732_s5 + $0x20] sm:$0xff]  }
  0x17   :  { %v409_v31 = vadd.s32 4294967256, %v30_v23  ;;  %v410_v33 = vadd.s32 4294967248, %v30_v23  ;;  %v411_v35 = vadd.s32 4294967240, %v30_v23  ;;  %v548_v45 = vld [vmem:[%s732_s5 + $0x18] sm:$0xff]   ;;  %v549_v46 = vld [vmem:[%s732_s5 + $0x10] sm:$0xff]   ;;  %v550_v55 = vld [vmem:[%s732_s5 + $0x8] sm:$0xff]  }
  0x18   :  { %v413_v47 = vld [vmem:[%s729_s2] ss:$0 sm:$0xff] }
  0x19   :  { %475 = vmatpush3.bf16.msra.mxu1 %v537_v15  ;;  %v551_v56 = vld [vmem:[%s732_s5] sm:$0xff]   ;;  %s397_s5 = sshll.u32 %s584_s20, 4  ;;  %s398_s5 = int_to_ptr.vmem [resolvable:$true] %s397_s5 }
  0x1a   :  { %476 = vmatprep.subr.bf16.mxu1 %v578_v6  ;;  %v419_v57 = vld [vmem:[%s731_s4] ss:$0 sm:$0xff]  ;;  %s552_s4 = scalar_lea.vmem %s398_s5, 64  ;;  %p557_p1 = scmp.lt.s32.totalorder %s398_s5, %s398_s5 }
  0x1b   :  { %v428_v1 = vld [vmem:[%s733_s6] ss:$0 sm:$0xff]  ;;  %p553_p0 = scmp.ne.s32.totalorder %s398_s5, %s552_s4  ;;  %p558_p2 = scmp.lt.s32.totalorder %s552_s4, %s552_s4 }
  0x1d   :  { %477 = vmatpush3.bf16.msra.mxu1 %v538_v16  ;;  %p559_p3 = por %p558_p2, %p557_p1 }
  0x1e   :  { %478 = vmatprep.subr.bf16.mxu1 %v578_v6 }
  0x1f   :  { %p560_p4 = pnand %p559_p3, %p553_p0 }
  0x21   :  { %479 = vmatpush3.bf16.msra.mxu1 %v539_v17 }
  0x22   :  { %480 = vmatprep.subr.bf16.mxu1 %v578_v6 }
  0x25   :  { %481 = vmatpush3.bf16.msra.mxu1 %v540_v18 }
  0x26   :  { %482 = vmatprep.subr.bf16.mxu1 %v578_v6 }
  0x29   :  { %483 = vmatpush3.bf16.msra.mxu1 %v541_v19 }
  0x2a   :  { %484 = vmatprep.subr.bf16.mxu1 %v578_v6 }
  0x2d   :  { %485 = vmatpush3.bf16.msra.mxu1 %v542_v39 }
  0x2e   :  { %486 = vmatprep.subr.bf16.mxu1 %v578_v6 }
  0x31   :  { %487 = vmatpush3.bf16.msra.mxu1 %v543_v40 }
  0x7d   :  { %v44_v21 = vpop.permute.xlu1 %43  ;;  %v33_v22 = vpop.permute.xlu0 %32 }
  0x7e   :  { %vm34_vm1 = vcmp.eq.s32.totalorder %v33_v22, %v30_v23  ;;  %vm45_vm4 = vcmp.eq.s32.totalorder %v44_v21, %v406_v27 }
  0x82   :  { %v50_v25 = vpop.permute.xlu1 %49  ;;  %v38_v26 = vpop.permute.xlu0 %37 }
  0x83   :  { %vm39_vm2 = vcmp.eq.s32.totalorder %v38_v26, %v405_v24  ;;  %vm51_vm7 = vcmp.eq.s32.totalorder %v50_v25, %v407_v30 }
  0x84   :  { %vm40_vm3 = vmor %vm34_vm1, %vm39_vm2  ;;  %vm119_vm1 = vcmask 523264  }
  0x85   :  { %vm46_vm5 = vmor %vm40_vm3, %vm45_vm4 }
  0x86   :  { %vm52_vm8 = vmor %vm46_vm5, %vm51_vm7 }
  0x87   :  { %v56_v29 = vpop.permute.xlu1 %55  ;;  %v62_v32 = vpop.permute.xlu0 %61 }
  0x88   :  { %vm57_vm6 = vcmp.eq.s32.totalorder %v56_v29, %v408_v28  ;;  %vm63_vm10 = vcmp.eq.s32.totalorder %v62_v32, %v409_v31 }
  0x89   :  { %vm58_vm9 = vmor %vm52_vm8, %vm57_vm6 }
  0x8a   :  { %vm64_vm12 = vmor %vm58_vm9, %vm63_vm10 }
  0x8c   :  { %v68_v34 = vpop.permute.xlu1 %67 }
  0x8d   :  { %vm69_vm11 = vcmp.eq.s32.totalorder %v68_v34, %v410_v33 }
  0x8e   :  { %vm70_vm13 = vmor %vm64_vm12, %vm69_vm11 }
  0x91   :  { %v74_v36 = vpop.permute.xlu1 %73 }
  0x92   :  { %vm75_vm14 = vcmp.eq.s32.totalorder %v74_v36, %v411_v35 }
  0x93   :  { %vm76_vm15 = vmor %vm70_vm13, %vm75_vm14 }
  0x94   :  { %v412_v37 = vsel %vm76_vm15, 1.0, %v578_v6 }
  0x95   :  { %v79_v38 = vpack.c.bf16 %v412_v37, %v412_v37 }
  0x97   :  { %469 = vmatmul.mubr.msk.bf16.vlgmr.msra.gmra.mxu0 %vm119_vm1, %v79_v38 }
  0x98   :  { %508 = vmatprep.mubr.msk.bf16.mxu0 %vm583_vm0, %v578_v6  ;;  %493 = vmatpush3.bf16.msra.mxu0 %v544_v41 }
  0x99   :  { %494 = vmatprep.subr.bf16.mxu0 %v578_v6 }
  0x9c   :  { %495 = vmatpush3.bf16.msra.mxu0 %v545_v42 }
  0x9d   :  { %496 = vmatprep.subr.bf16.mxu0 %v578_v6 }
  0xa0   :  { %497 = vmatpush3.bf16.msra.mxu0 %v546_v43 }
  0xa1   :  { %498 = vmatprep.subr.bf16.mxu0 %v578_v6 }
  0xa4   :  { %499 = vmatpush3.bf16.msra.mxu0 %v547_v44 }
  0xa5   :  { %500 = vmatprep.subr.bf16.mxu0 %v578_v6 }
  0xa8   :  { %501 = vmatpush3.bf16.msra.mxu0 %v548_v45 }
  0xa9   :  { %502 = vmatprep.subr.bf16.mxu0 %v578_v6 }
  0xac   :  { %503 = vmatpush3.bf16.msra.mxu0 %v549_v46 }
  0xad   :  { %504 = vmatprep.subr.bf16.mxu0 %v578_v6 }
  0xb0   :  { %505 = vmatpush3.bf16.msra.mxu0 %v550_v55 }
  0xb1   :  { %506 = vmatprep.subr.bf16.mxu0 %v578_v6 }
  0xb4   :  { %507 = vmatpush3.bf16.msra.mxu0 %v551_v56 }
 0x157   :  { %v157_v48 = vpop.f32.mrf.mxu0 }
 0x158   :  { %v158_v49 = vadd.f32 %v413_v47, %v157_v48 }
 0x159   :  { %v470_v50 = vpop.f32.mrf.mxu0 }
 0x15a   :  { %v163_v51 = vmax.f32 %v158_v49, 0.0 }
 0x15b   :  { %v160_v52 = vpop.f32.mrf.mxu0 }
 0x15c   :  { %v164_v53 = vpack.c.bf16 %v163_v51, %v163_v51 }
 0x15d   :  { %v471_v54 = vpop.f32.mrf.mxu0 }
 0x15e   :  { %489 = vmatmul.mubr.bf16.vlgmr.msra.gmra.mxu1 %v164_v53 }
 0x21e   :  { %v270_v58 = vpop.f32.mrf.mxu1 }
 0x21f   :  { %v271_v59 = vadd.f32 %v419_v57, %v270_v58 }
 0x220   :  { %v490_v60 = vpop.f32.mrf.mxu1 }
 0x221   :  { %v276_v61 = vmax.f32 %v271_v59, 0.0 }
 0x222   :  { %v273_v62 = vpop.f32.mrf.mxu1 }
 0x223   :  { %v277_v63 = vpack.c.bf16 %v276_v61, %v276_v61 }
 0x224   :  { %v491_v0 = vpop.f32.mrf.mxu1 }
 0x225   :  { %509 = vmatmul.mubr.bf16.vlgmr.msra.gmra.mxu0 %v277_v63 }
 0x2e5   :  { %v383_v2 = vpop.f32.mrf.mxu0 }
 0x2e6   :  { %v384_v3 = vadd.f32 %v428_v1, %v383_v2 }
 0x2e7   :  { %v510_v4 = vpop.f32.mrf.mxu0 }
 0x2e8   :  { %v389_v5 = vpack.c.bf16 %v384_v3, %v384_v3 }
 0x2e9   :  { %v386_v6 = vpop.f32.mrf.mxu0 }
 0x2ea   :  { %390 = vst [vmem:[#allocation2] sm:$0xf] %v389_v5 }
 0x2eb   :  { %v511_v7 = vpop.f32.mrf.mxu0 }
 0x2ec   :  { %563 = shalt.err (!%p560_p4)
}
 0x2ed   :  { %400 = dma.vmem_to_hbm [thread:$0]  %s398_s5, 64, %s734_s7, [#allocation3]  }
 0x2ee   :  { %572 = dma.done.wait [#allocation3], 64  }
 0x2ef   :  { %573 = vsyncadd [#allocation3], 4294967232 }
 0x2f0   :  { %404 = vsyncpa [#allocation3], 1 }

</bundles_post_ra>
